<compile_context>
chip_gen: v6e
topology: v6e:2x2x1
jax: 0.10.0
libtpu: 0.0.40
codegen_flags: <defaults>
</compile_context>

<pallas_src>
import functools

import jax
import jax.numpy as jnp
from jax import lax
from jax.experimental import pallas as pl
from jax.experimental.pallas import tpu as pltpu

EPS = 1e-5
_INV_SQRT2 = 0.7071067811865476


def _down_scale_kernel(x_ref, w_ref, o_ref, *, ho, wo, hq):
    """One (image n, Cout-tile j) grid step.

    x_ref: (4*hq, wq, C)  phase-packed, spatially padded input (native dtype);
                          phase p = 2*pi + pj lives in rows [p*hq, (p+1)*hq).
    w_ref: (9, C, TCOUT)  conv taps, tap t = ki*3 + kj, Cout zero-padded to lane-dense TCOUT.
    o_ref: (P, TCOUT)     P = ho*wo output positions (row-major), lane-dense channels.
    """
    p = ho * wo
    cin = x_ref.shape[-1]

    # ---- Conv2d(k=3, stride=2, pad=1) as 9 accumulating MXU matmuls (fused im2col) ----
    acc = jnp.zeros(o_ref.shape, jnp.float32)
    for ki in range(3):
        for kj in range(3):
            phase = 2 * (ki % 2) + (kj % 2)
            di, dj = ki // 2, kj // 2
            # tap value at output (ho_, wo_) = padded input at (2*ho_ + ki, 2*wo_ + kj)
            tap = x_ref[pl.ds(phase * hq + di, ho), pl.ds(dj, wo), :]      # (ho, wo, C)
            acc = acc + jnp.dot(tap.reshape(p, cin), w_ref[ki * 3 + kj],
                                preferred_element_type=jnp.float32)

    # ---- InstanceNorm2d: per-channel (lane) stats over the P spatial rows ----
    mean = jnp.mean(acc, axis=0, keepdims=True)
    cen = acc - mean
    var = jnp.mean(cen * cen, axis=0, keepdims=True)        # biased variance (PyTorch)
    yn = cen * lax.rsqrt(var + EPS)

    # ---- GELU (exact / erf form; PyTorch default approximate='none') ----
    out = 0.5 * yn * (1.0 + lax.erf(yn * _INV_SQRT2))
    o_ref[...] = out.astype(o_ref.dtype)


@functools.partial(jax.jit, static_argnames=("out_layout",))
def down_scale(x_nchw, weight, out_layout="NCHW"):
    """x_nchw: (N, C, H, W); weight: (2C, C, 3, 3) (PyTorch OIHW layout).

    Returns (N, 2C, H//2, W//2) NCHW by default (PyTorch parity), or NHWC if requested."""
    N, C, H, W = x_nchw.shape
    Cout, Cin, kh, kw = weight.shape
    assert (Cin, kh, kw) == (C, 3, 3)
    assert H % 2 == 0 and W % 2 == 0, "stride-2 downscale expects even spatial dims"
    Ho, Wo = H // 2, W // 2
    P = Ho * Wo
    Hq, Wq = Ho + 1, Wo + 1            # phase sub-image size of the padded input

    # --- single cheap space-to-depth pass (replaces a 9x im2col materialization) ---
    x = jnp.transpose(x_nchw, (0, 2, 3, 1))                        # NHWC
    xp = jnp.pad(x, ((0, 0), (1, 1), (1, 1), (0, 0)))              # (N, H+2, W+2, C)
    # stride-2 phase split: phase (pi, pj) holds xp[:, pi::2, pj::2, :]; stacked along H.
    xph = jnp.concatenate(
        [xp[:, pi::2, pj::2, :] for pi in range(2) for pj in range(2)], axis=1
    )                                                              # (N, 4*Hq, Wq, C)

    # --- weights: OIHW -> (tap, Cin, Cout); zero-pad Cout to a lane-dense multiple of 128 ---
    Coutp = max(128, -(-Cout // 128) * 128)
    w = jnp.transpose(weight, (2, 3, 1, 0)).reshape(9, C, Cout)
    w = jnp.pad(w, ((0, 0), (0, 0), (0, Coutp - Cout))).astype(x.dtype)

    # 256-wide Cout tiles fill the v6e/v7x MXU; 128 otherwise (v5e MXU is 128-wide).
    TCOUT = 256 if Coutp % 256 == 0 else 128
    grid = (N, Coutp // TCOUT)

    kernel = functools.partial(_down_scale_kernel, ho=Ho, wo=Wo, hq=Hq)

    # --- advisory cost model + shape-derived VMEM cap (kept within v7x's 64 MiB) ---
    itemsize = jnp.dtype(x.dtype).itemsize
    flops = 2 * N * P * 9 * C * Coutp + 10 * N * P * Coutp
    transcendentals = 2 * N * P * Coutp                            # erf + rsqrt
    bytes_accessed = (xph.size + w.size) * itemsize + N * P * Coutp * itemsize
    rnd = lambda v, m: -(-v // m) * m
    blk_bytes = (
        2 * 4 * Hq * rnd(Wq, 8) * rnd(C, 128) * itemsize           # double-buffered input
        + 2 * 9 * rnd(C, 8) * TCOUT * itemsize                     # double-buffered weights
        + 2 * rnd(P, 8) * TCOUT * itemsize                         # double-buffered output
        + 4 * rnd(P, 8) * TCOUT * 4                                # f32 acc / temporaries
    )
    vmem_limit = min(64 * 1024 * 1024, max(32 * 1024 * 1024, int(blk_bytes * 3 // 2)))

    # NOTE: for very large H*W the (P, TCOUT) block / accumulator should additionally be
    # tiled over a P grid axis with a two-pass (sum / sum-of-squares) InstanceNorm, keeping
    # VMEM bounded on v7x (64 MiB).  Not needed at the small shapes exercised here.
    # TODO(synk): spatial (P) tiling + two-pass InstanceNorm for very large feature maps.
    out = pl.pallas_call(
        kernel,
        out_shape=jax.ShapeDtypeStruct((N, P, Coutp), x.dtype),
        grid_spec=pltpu.PrefetchScalarGridSpec(
            num_scalar_prefetch=0,
            grid=grid,
            in_specs=[
                # phase-packed input for image n (block index constant across Cout tiles,
                # so it is not re-DMAed while j varies — n is the slow grid axis)
                pl.BlockSpec((pl.Squeezed(), 4 * Hq, Wq, C),
                             lambda n, j: (n, 0, 0, 0)),
                # conv taps for Cout tile j (constant over n; small, ~tens of KB)
                pl.BlockSpec((9, C, TCOUT), lambda n, j: (0, 0, j)),
            ],
            out_specs=pl.BlockSpec((pl.Squeezed(), P, TCOUT),
                                   lambda n, j: (n, 0, j)),
        ),
        compiler_params=pltpu.CompilerParams(
            dimension_semantics=("parallel", "parallel"),
            vmem_limit_bytes=vmem_limit,
        ),
        cost_estimate=pl.CostEstimate(flops=flops,
                                      transcendentals=transcendentals,
                                      bytes_accessed=bytes_accessed),
    )(xph, w)                                                      # (N, P, Coutp)

    out = out[:, :, :Cout].reshape(N, Ho, Wo, Cout)                # NHWC
    if out_layout == "NHWC":
        return out
    return jnp.transpose(out, (0, 3, 1, 2))                        # NCHW (PyTorch parity)


def _reference(x_nchw, weight):
    """Plain-JAX reference of the same forward pass (for sanity checking)."""
    y = lax.conv_general_dilated(
        x_nchw, weight, window_strides=(2, 2), padding=((1, 1), (1, 1)),
        dimension_numbers=("NCHW", "OIHW", "NCHW"))
    mean = jnp.mean(y, axis=(2, 3), keepdims=True)
    var = jnp.mean((y - mean) ** 2, axis=(2, 3), keepdims=True)
    yn = (y - mean) * lax.rsqrt(var + EPS)
    return 0.5 * yn * (1.0 + lax.erf(yn / jnp.sqrt(2.0)))


if __name__ == "__main__":
    key = jax.random.PRNGKey(0)
    kx, kw_key = jax.random.split(key)

    N, C, H, W = 2, 4, 16, 16
    Cout = 2 * C

    x = jax.random.normal(kx, (N, C, H, W), dtype=jnp.float32)
    # Deterministic synthetic conv weight (PyTorch layout: (Cout, Cin, kH, kW)).
    weight = 0.1 * jax.random.normal(kw_key, (Cout, C, 3, 3), dtype=jnp.float32)

    out = jax.block_until_ready(down_scale(x, weight))
    ref = jax.block_until_ready(_reference(x, weight))

    assert out.shape == (N, Cout, H // 2, W // 2)
    assert jnp.allclose(out, ref, atol=1e-4, rtol=1e-4)

    print("KERNEL_OK")
</pallas_src>

<mosaic_0001>
module attributes {stable_mosaic.version = 11 : i64} {
  func.func @_down_scale_kernel(%arg0: i32, %arg1: i32, %arg2: memref<1x36x9x4xf32, #tpu.memory_space<vmem>>, %arg3: memref<9x4x128xf32, #tpu.memory_space<vmem>>, %arg4: memref<1x64x128xf32, #tpu.memory_space<vmem>>) attributes {dimension_semantics = [#tpu.dimension_semantics<parallel>, #tpu.dimension_semantics<parallel>], iteration_bounds = array<i64: 2, 1>, scalar_prefetch = 0 : i64, scratch_operands = 0 : i64, tpu.core_type = #tpu.core_type<tc>, window_params = [{transform_indices = @transform_0, window_bounds = array<i64: 1, 36, 9, 4>}, {transform_indices = @transform_1, window_bounds = array<i64: 9, 4, 128>}, {transform_indices = @transform_2, window_bounds = array<i64: 1, 64, 128>}]} {
    %cst = arith.constant 0.000000e+00 : f32
    %0 = vector.broadcast %cst : f32 to vector<64x128xf32>
    %c0 = arith.constant 0 : index
    %c0_0 = arith.constant 0 : index
    %c0_1 = arith.constant 0 : index
    %c0_2 = arith.constant 0 : index
    %1 = vector.load %arg2[%c0, %c0_0, %c0_1, %c0_2] : memref<1x36x9x4xf32, #tpu.memory_space<vmem>>, vector<1x8x8x4xf32>
    %2 = vector.shape_cast %1 : vector<1x8x8x4xf32> to vector<8x8x4xf32>
    %3 = vector.shape_cast %2 : vector<8x8x4xf32> to vector<64x4xf32>
    %c0_3 = arith.constant 0 : index
    %c0_4 = arith.constant 0 : index
    %c0_5 = arith.constant 0 : index
    %4 = vector.load %arg3[%c0_3, %c0_4, %c0_5] : memref<9x4x128xf32, #tpu.memory_space<vmem>>, vector<1x4x128xf32>
    %5 = vector.shape_cast %4 : vector<1x4x128xf32> to vector<4x128xf32>
    %cst_6 = arith.constant dense<0.000000e+00> : vector<64x128xf32>
    %6 = tpu.matmul %3, %5, %cst_6 {dimension_numbers = #tpu.dot_dimension_numbers<[1], [0], [0], [1], [0, 0, 1, 1], [], []>} : vector<64x4xf32>, vector<4x128xf32>, vector<64x128xf32> -> vector<64x128xf32>
    %7 = arith.addf %0, %6 : vector<64x128xf32>
    %c0_7 = arith.constant 0 : index
    %c9 = arith.constant 9 : index
    %c0_8 = arith.constant 0 : index
    %c0_9 = arith.constant 0 : index
    %8 = vector.load %arg2[%c0_7, %c9, %c0_8, %c0_9] : memref<1x36x9x4xf32, #tpu.memory_space<vmem>>, vector<1x8x8x4xf32>
    %9 = vector.shape_cast %8 : vector<1x8x8x4xf32> to vector<8x8x4xf32>
    %10 = vector.shape_cast %9 : vector<8x8x4xf32> to vector<64x4xf32>
    %c1 = arith.constant 1 : index
    %c0_10 = arith.constant 0 : index
    %c0_11 = arith.constant 0 : index
    %11 = vector.load %arg3[%c1, %c0_10, %c0_11] : memref<9x4x128xf32, #tpu.memory_space<vmem>>, vector<1x4x128xf32>
    %12 = vector.shape_cast %11 : vector<1x4x128xf32> to vector<4x128xf32>
    %cst_12 = arith.constant dense<0.000000e+00> : vector<64x128xf32>
    %13 = tpu.matmul %10, %12, %cst_12 {dimension_numbers = #tpu.dot_dimension_numbers<[1], [0], [0], [1], [0, 0, 1, 1], [], []>} : vector<64x4xf32>, vector<4x128xf32>, vector<64x128xf32> -> vector<64x128xf32>
    %14 = arith.addf %7, %13 : vector<64x128xf32>
    %c0_13 = arith.constant 0 : index
    %c0_14 = arith.constant 0 : index
    %c1_15 = arith.constant 1 : index
    %c0_16 = arith.constant 0 : index
    %15 = vector.load %arg2[%c0_13, %c0_14, %c1_15, %c0_16] : memref<1x36x9x4xf32, #tpu.memory_space<vmem>>, vector<1x8x8x4xf32>
    %16 = vector.shape_cast %15 : vector<1x8x8x4xf32> to vector<8x8x4xf32>
    %17 = vector.shape_cast %16 : vector<8x8x4xf32> to vector<64x4xf32>
    %c2 = arith.constant 2 : index
    %c0_17 = arith.constant 0 : index
    %c0_18 = arith.constant 0 : index
    %18 = vector.load %arg3[%c2, %c0_17, %c0_18] : memref<9x4x128xf32, #tpu.memory_space<vmem>>, vector<1x4x128xf32>
    %19 = vector.shape_cast %18 : vector<1x4x128xf32> to vector<4x128xf32>
    %cst_19 = arith.constant dense<0.000000e+00> : vector<64x128xf32>
    %20 = tpu.matmul %17, %19, %cst_19 {dimension_numbers = #tpu.dot_dimension_numbers<[1], [0], [0], [1], [0, 0, 1, 1], [], []>} : vector<64x4xf32>, vector<4x128xf32>, vector<64x128xf32> -> vector<64x128xf32>
    %21 = arith.addf %14, %20 : vector<64x128xf32>
    %c0_20 = arith.constant 0 : index
    %c18 = arith.constant 18 : index
    %c0_21 = arith.constant 0 : index
    %c0_22 = arith.constant 0 : index
    %22 = vector.load %arg2[%c0_20, %c18, %c0_21, %c0_22] : memref<1x36x9x4xf32, #tpu.memory_space<vmem>>, vector<1x8x8x4xf32>
    %23 = vector.shape_cast %22 : vector<1x8x8x4xf32> to vector<8x8x4xf32>
    %24 = vector.shape_cast %23 : vector<8x8x4xf32> to vector<64x4xf32>
    %c3 = arith.constant 3 : index
    %c0_23 = arith.constant 0 : index
    %c0_24 = arith.constant 0 : index
    %25 = vector.load %arg3[%c3, %c0_23, %c0_24] : memref<9x4x128xf32, #tpu.memory_space<vmem>>, vector<1x4x128xf32>
    %26 = vector.shape_cast %25 : vector<1x4x128xf32> to vector<4x128xf32>
    %cst_25 = arith.constant dense<0.000000e+00> : vector<64x128xf32>
    %27 = tpu.matmul %24, %26, %cst_25 {dimension_numbers = #tpu.dot_dimension_numbers<[1], [0], [0], [1], [0, 0, 1, 1], [], []>} : vector<64x4xf32>, vector<4x128xf32>, vector<64x128xf32> -> vector<64x128xf32>
    %28 = arith.addf %21, %27 : vector<64x128xf32>
    %c0_26 = arith.constant 0 : index
    %c27 = arith.constant 27 : index
    %c0_27 = arith.constant 0 : index
    %c0_28 = arith.constant 0 : index
    %29 = vector.load %arg2[%c0_26, %c27, %c0_27, %c0_28] : memref<1x36x9x4xf32, #tpu.memory_space<vmem>>, vector<1x8x8x4xf32>
    %30 = vector.shape_cast %29 : vector<1x8x8x4xf32> to vector<8x8x4xf32>
    %31 = vector.shape_cast %30 : vector<8x8x4xf32> to vector<64x4xf32>
    %c4 = arith.constant 4 : index
    %c0_29 = arith.constant 0 : index
    %c0_30 = arith.constant 0 : index
    %32 = vector.load %arg3[%c4, %c0_29, %c0_30] : memref<9x4x128xf32, #tpu.memory_space<vmem>>, vector<1x4x128xf32>
    %33 = vector.shape_cast %32 : vector<1x4x128xf32> to vector<4x128xf32>
    %cst_31 = arith.constant dense<0.000000e+00> : vector<64x128xf32>
    %34 = tpu.matmul %31, %33, %cst_31 {dimension_numbers = #tpu.dot_dimension_numbers<[1], [0], [0], [1], [0, 0, 1, 1], [], []>} : vector<64x4xf32>, vector<4x128xf32>, vector<64x128xf32> -> vector<64x128xf32>
    %35 = arith.addf %28, %34 : vector<64x128xf32>
    %c0_32 = arith.constant 0 : index
    %c18_33 = arith.constant 18 : index
    %c1_34 = arith.constant 1 : index
    %c0_35 = arith.constant 0 : index
    %36 = vector.load %arg2[%c0_32, %c18_33, %c1_34, %c0_35] : memref<1x36x9x4xf32, #tpu.memory_space<vmem>>, vector<1x8x8x4xf32>
    %37 = vector.shape_cast %36 : vector<1x8x8x4xf32> to vector<8x8x4xf32>
    %38 = vector.shape_cast %37 : vector<8x8x4xf32> to vector<64x4xf32>
    %c5 = arith.constant 5 : index
    %c0_36 = arith.constant 0 : index
    %c0_37 = arith.constant 0 : index
    %39 = vector.load %arg3[%c5, %c0_36, %c0_37] : memref<9x4x128xf32, #tpu.memory_space<vmem>>, vector<1x4x128xf32>
    %40 = vector.shape_cast %39 : vector<1x4x128xf32> to vector<4x128xf32>
    %cst_38 = arith.constant dense<0.000000e+00> : vector<64x128xf32>
    %41 = tpu.matmul %38, %40, %cst_38 {dimension_numbers = #tpu.dot_dimension_numbers<[1], [0], [0], [1], [0, 0, 1, 1], [], []>} : vector<64x4xf32>, vector<4x128xf32>, vector<64x128xf32> -> vector<64x128xf32>
    %42 = arith.addf %35, %41 : vector<64x128xf32>
    %c0_39 = arith.constant 0 : index
    %c1_40 = arith.constant 1 : index
    %c0_41 = arith.constant 0 : index
    %c0_42 = arith.constant 0 : index
    %43 = vector.load %arg2[%c0_39, %c1_40, %c0_41, %c0_42] : memref<1x36x9x4xf32, #tpu.memory_space<vmem>>, vector<1x8x8x4xf32>
    %44 = vector.shape_cast %43 : vector<1x8x8x4xf32> to vector<8x8x4xf32>
    %45 = vector.shape_cast %44 : vector<8x8x4xf32> to vector<64x4xf32>
    %c6 = arith.constant 6 : index
    %c0_43 = arith.constant 0 : index
    %c0_44 = arith.constant 0 : index
    %46 = vector.load %arg3[%c6, %c0_43, %c0_44] : memref<9x4x128xf32, #tpu.memory_space<vmem>>, vector<1x4x128xf32>
    %47 = vector.shape_cast %46 : vector<1x4x128xf32> to vector<4x128xf32>
    %cst_45 = arith.constant dense<0.000000e+00> : vector<64x128xf32>
    %48 = tpu.matmul %45, %47, %cst_45 {dimension_numbers = #tpu.dot_dimension_numbers<[1], [0], [0], [1], [0, 0, 1, 1], [], []>} : vector<64x4xf32>, vector<4x128xf32>, vector<64x128xf32> -> vector<64x128xf32>
    %49 = arith.addf %42, %48 : vector<64x128xf32>
    %c0_46 = arith.constant 0 : index
    %c10 = arith.constant 10 : index
    %c0_47 = arith.constant 0 : index
    %c0_48 = arith.constant 0 : index
    %50 = vector.load %arg2[%c0_46, %c10, %c0_47, %c0_48] : memref<1x36x9x4xf32, #tpu.memory_space<vmem>>, vector<1x8x8x4xf32>
    %51 = vector.shape_cast %50 : vector<1x8x8x4xf32> to vector<8x8x4xf32>
    %52 = vector.shape_cast %51 : vector<8x8x4xf32> to vector<64x4xf32>
    %c7 = arith.constant 7 : index
    %c0_49 = arith.constant 0 : index
    %c0_50 = arith.constant 0 : index
    %53 = vector.load %arg3[%c7, %c0_49, %c0_50] : memref<9x4x128xf32, #tpu.memory_space<vmem>>, vector<1x4x128xf32>
    %54 = vector.shape_cast %53 : vector<1x4x128xf32> to vector<4x128xf32>
    %cst_51 = arith.constant dense<0.000000e+00> : vector<64x128xf32>
    %55 = tpu.matmul %52, %54, %cst_51 {dimension_numbers = #tpu.dot_dimension_numbers<[1], [0], [0], [1], [0, 0, 1, 1], [], []>} : vector<64x4xf32>, vector<4x128xf32>, vector<64x128xf32> -> vector<64x128xf32>
    %56 = arith.addf %49, %55 : vector<64x128xf32>
    %c0_52 = arith.constant 0 : index
    %c1_53 = arith.constant 1 : index
    %c1_54 = arith.constant 1 : index
    %c0_55 = arith.constant 0 : index
    %57 = vector.load %arg2[%c0_52, %c1_53, %c1_54, %c0_55] : memref<1x36x9x4xf32, #tpu.memory_space<vmem>>, vector<1x8x8x4xf32>
    %58 = vector.shape_cast %57 : vector<1x8x8x4xf32> to vector<8x8x4xf32>
    %59 = vector.shape_cast %58 : vector<8x8x4xf32> to vector<64x4xf32>
    %c8 = arith.constant 8 : index
    %c0_56 = arith.constant 0 : index
    %c0_57 = arith.constant 0 : index
    %60 = vector.load %arg3[%c8, %c0_56, %c0_57] : memref<9x4x128xf32, #tpu.memory_space<vmem>>, vector<1x4x128xf32>
    %61 = vector.shape_cast %60 : vector<1x4x128xf32> to vector<4x128xf32>
    %cst_58 = arith.constant dense<0.000000e+00> : vector<64x128xf32>
    %62 = tpu.matmul %59, %61, %cst_58 {dimension_numbers = #tpu.dot_dimension_numbers<[1], [0], [0], [1], [0, 0, 1, 1], [], []>} : vector<64x4xf32>, vector<4x128xf32>, vector<64x128xf32> -> vector<64x128xf32>
    %63 = arith.addf %56, %62 : vector<64x128xf32>
    %cst_59 = arith.constant dense<0.000000e+00> : vector<128xf32>
    %64 = vector.multi_reduction <add>, %63, %cst_59 [0] : vector<64x128xf32> to vector<128xf32>
    %65 = vector.shape_cast %64 : vector<128xf32> to vector<1x128xf32>
    %cst_60 = arith.constant 6.400000e+01 : f32
    %66 = vector.broadcast %cst_60 : f32 to vector<1x128xf32>
    %67 = arith.divf %65, %66 : vector<1x128xf32>
    %68 = vector.broadcast %67 : vector<1x128xf32> to vector<64x128xf32>
    %69 = arith.subf %63, %68 : vector<64x128xf32>
    %70 = arith.mulf %69, %69 : vector<64x128xf32>
    %cst_61 = arith.constant dense<0.000000e+00> : vector<128xf32>
    %71 = vector.multi_reduction <add>, %70, %cst_61 [0] : vector<64x128xf32> to vector<128xf32>
    %72 = vector.shape_cast %71 : vector<128xf32> to vector<1x128xf32>
    %cst_62 = arith.constant 6.400000e+01 : f32
    %73 = vector.broadcast %cst_62 : f32 to vector<1x128xf32>
    %74 = arith.divf %72, %73 : vector<1x128xf32>
    %cst_63 = arith.constant 9.99999974E-6 : f32
    %75 = vector.broadcast %cst_63 : f32 to vector<1x128xf32>
    %76 = arith.addf %74, %75 : vector<1x128xf32>
    %77 = math.rsqrt %76 : vector<1x128xf32>
    %78 = vector.broadcast %77 : vector<1x128xf32> to vector<64x128xf32>
    %79 = arith.mulf %69, %78 : vector<64x128xf32>
    %cst_64 = arith.constant 5.000000e-01 : f32
    %80 = vector.broadcast %cst_64 : f32 to vector<64x128xf32>
    %81 = arith.mulf %80, %79 : vector<64x128xf32>
    %cst_65 = arith.constant 0.707106769 : f32
    %82 = vector.broadcast %cst_65 : f32 to vector<64x128xf32>
    %83 = arith.mulf %79, %82 : vector<64x128xf32>
    %84 = math.erf %83 : vector<64x128xf32>
    %cst_66 = arith.constant 1.000000e+00 : f32
    %85 = vector.broadcast %cst_66 : f32 to vector<64x128xf32>
    %86 = arith.addf %85, %84 : vector<64x128xf32>
    %87 = arith.mulf %81, %86 : vector<64x128xf32>
    %c0_67 = arith.constant 0 : index
    %c0_68 = arith.constant 0 : index
    %c0_69 = arith.constant 0 : index
    %88 = vector.load %arg4[%c0_67, %c0_68, %c0_69] : memref<1x64x128xf32, #tpu.memory_space<vmem>>, vector<1x64x128xf32>
    %89 = vector.shape_cast %88 : vector<1x64x128xf32> to vector<64x128xf32>
    %90 = vector.shape_cast %87 : vector<64x128xf32> to vector<1x64x128xf32>
    tpu.vector_store %arg4[%c0_67, %c0_68, %c0_69], %90 {strides = array<i32>} : memref<1x64x128xf32, #tpu.memory_space<vmem>>, vector<1x64x128xf32>,
    return
  }
  func.func @transform_0(%arg0: i32, %arg1: i32) -> (i32, i32, i32, i32) {
    %c0_i32 = arith.constant 0 : i32
    %c0_i32_0 = arith.constant 0 : i32
    %c0_i32_1 = arith.constant 0 : i32
    %c0_i32_2 = arith.constant 0 : i32
    return %arg0, %c0_i32, %c0_i32_0, %c0_i32_1 : i32, i32, i32, i32
  }
  func.func @transform_1(%arg0: i32, %arg1: i32) -> (i32, i32, i32) {
    %c0_i32 = arith.constant 0 : i32
    %c0_i32_0 = arith.constant 0 : i32
    %c0_i32_1 = arith.constant 0 : i32
    return %c0_i32, %c0_i32_0, %arg1 : i32, i32, i32
  }
  func.func @transform_2(%arg0: i32, %arg1: i32) -> (i32, i32, i32) {
    %c0_i32 = arith.constant 0 : i32
    %c0_i32_0 = arith.constant 0 : i32
    return %arg0, %c0_i32, %arg1 : i32, i32, i32
  }
}

</mosaic_0001>

<bundles_post_ra>
// kernel: down_scale.1
= control target key start
LH: loop header
LB: loop body
LE: loop exit
PB: predicated region body
PF: predicated region fallthrough
CT: control target
= control target key end

     0   :  { %s2165_s9 = smov 0   ;;  %s2167_s10 = smov 0   ;;  %s2480_s0 = inlined_call_operand.vmem [shape: f32[2,36,9,4], index: 0, kind: input, shape index: {}]   ;;  %s2481_s1 = inlined_call_operand.vmem [shape: f32[9,4,128], index: 1, kind: input, shape index: {}]   ;;  %s2482_s2 = inlined_call_operand.vmem [shape: f32[2,64,128], index: 2, kind: output, shape index: {}]  }
   0x1   :  { %s2169_s11 = smov 0  }
   0x2 LB: > { %s24_s12 = sadd.s32 1, %s2144_s10  ;;  %p1722_p0 = scmp.ge.s32.totalorder %s2148_s11, 1  ;;  %s2148_s11 = sphi %s2169_s11, %s12_s11   ;;  %s2144_s10 = sphi %s2167_s10, %s2484_s10   ;;  %s2140_s9 = sphi %s2165_s9, %s2483_s9  }
   0x3   : > { %p26_p1 = scmp.ge.s32.totalorder %s24_s12, 2  ;;  %p135_p2 = scmp.lt.s32.totalorder %s2148_s11, 3 }
   0x5   : > { %s2486_s12 = smov (%p26_p1, %s24_s12), 0  ;;  %p136_p3 = pnand %p1722_p0, %p135_p2 }
   0x6   : > { %p164_p4 = scmp.lt.s32.totalorder (!%p136_p3), %s2140_s9, 1 }
   0x7   : > { %139 = sbr.rel (%p136_p3) target bundleno = 382 (0x17e), region = 28 }
   0xc   : > { %v1734_v0 = vld [vmem:[%s2481_s1 + $0x4] sm:$0xf]  ;;  %vm226_vm0 = vcmask 1043456   ;;  %v189_v1 = vld [vmem:[%s2481_s1] sm:$0xf]  ;;  %s2488_s9 = smov (!%p164_p4, %s2140_s9), 1 }
   0xd   : > { %2081 = vmatprep.subr.msk.mxu1 %vm226_vm0, %v1734_v0  ;;  %1955 = vmatprep.subr.msk.mxu0 %vm226_vm0, %v1734_v0  ;;  %v1753_v2 = vld [vmem:[%s2481_s1 + $0x8] sm:$0xf]  ;;  %s2083_s19 = smul.u32 576, %s2488_s9  ;;  %vm201_vm1 = vcmask 31744   ;;  %v1771_v9 = vld [vmem:[%s2481_s1 + $0xc] sm:$0xf] }
   0xe   : > { %2082 = vmatpush3.msk.msra.mxu1 %vm226_vm0, %v1734_v0  ;;  %1956 = vmatpush3.msk.msra.mxu0 %vm226_vm0, %v1734_v0  ;;  %v1789_v10 = vld [vmem:[%s2481_s1 + $0x10] sm:$0xf]  ;;  %v1807_v19 = vld [vmem:[%s2481_s1 + $0x14] sm:$0xf]  ;;  %v1825_v20 = vld [vmem:[%s2481_s1 + $0x18] sm:$0xf] }
   0xf   : > { %1969 = vmatprep.subr.msk.mxu1 %vm226_vm0, %v189_v1  ;;  %1983 = vmatprep.subr.msk.mxu0 %vm226_vm0, %v1753_v2  ;;  %s2204_s22 = scalar_lea.vmem %s2480_s0, %s2083_s19  ;;  %v1843_v37 = vld [vmem:[%s2481_s1 + $0x1c] sm:$0xf]  ;;  %v1861_v38 = vld [vmem:[%s2481_s1 + $0x20] sm:$0xf]  ;;  %s1873_s7 = sshll.u32 %s2488_s9, 6 }
  0x10   : > { %v1726_v3 = vld [vmem:[%s2204_s22 + $0x90] sm:$0xff]  ;;  %v2211_v5 = vld [vmem:[%s2204_s22 + $0xa0] sm:$0xff]  ;;  %s2461_s14 = scalar_lea.vmem %s2482_s2, %s1873_s7 }
  0x11   : > { %v2208_v4 = vld [vmem:[%s2204_s22 + $0xd0] sm:$0xff]  ;;  %1957 = vmatprep.mubr.msk.f32.mxu0 %vm201_vm1, %v1726_v3  ;;  %v2217_v6 = vld [vmem:[%s2204_s22 + $0xe0] sm:$0xff] }
  0x12   : > { %1963 = vmatprep.mubr.msk.f32.mxu1 %vm201_vm1, %v2208_v4  ;;  %v2220_v7 = vld [vmem:[%s2204_s22 + $0xb0] sm:$0xff]  ;;  %1958 = vmatmul.mubr.msk.f32.vlgmr.msra.gmra.mxu0 %vm201_vm1, %v2211_v5  ;;  %v2238_v11 = vld [vmem:[%s2204_s22 + $0xc0] sm:$0xff] }
  0x13   : > { %v2223_v8 = vld [vmem:[%s2204_s22 + $0xf0] sm:$0xff]  ;;  %1964 = vmatmul.mubr.msk.f32.vlgmr.msra.gmra.mxu1 %vm201_vm1, %v2217_v6  ;;  %1984 = vmatpush3.msk.msra.mxu0 %vm226_vm0, %v1753_v2  ;;  %v2241_v12 = vld [vmem:[%s2204_s22 + $0x100] sm:$0xff] }
  0x14   : > { %1970 = vmatpush3.msk.msra.mxu1 %vm226_vm0, %v189_v1  ;;  %1960 = vmatprep.mubr.msk.f32.mxu0 %vm201_vm1, %v2220_v7  ;;  %v181_v13 = vld [vmem:[%s2204_s22] sm:$0xff]  ;;  %v2258_v15 = vld [vmem:[%s2204_s22 + $0x10] sm:$0xff] }
  0x15   : > { %1966 = vmatprep.mubr.msk.f32.mxu1 %vm201_vm1, %v2223_v8  ;;  %v467_v14 = vld [vmem:[%s2204_s22 + $0x1] sm:$0xff]  ;;  %1997 = vmatprep.subr.msk.mxu1 %vm226_vm0, %v1771_v9  ;;  %v2261_v16 = vld [vmem:[%s2204_s22 + $0x11] sm:$0xff] }
  0x16   : > { %2011 = vmatprep.subr.msk.mxu0 %vm226_vm0, %v1789_v10  ;;  %1961 = vmatmul.mubr.msk.f32.gmra.mxu0 %vm201_vm1, %v2238_v11  ;;  %v2264_v17 = vld [vmem:[%s2204_s22 + $0x20] sm:$0xff]  ;;  %v2282_v21 = vld [vmem:[%s2204_s22 + $0x30] sm:$0xff] }
  0x17   : > { %1967 = vmatmul.mubr.msk.f32.gmra.mxu1 %vm201_vm1, %v2241_v12  ;;  %1985 = vmatprep.mubr.msk.f32.mxu0 %vm201_vm1, %v467_v14  ;;  %v2267_v18 = vld [vmem:[%s2204_s22 + $0x21] sm:$0xff]  ;;  %v2285_v22 = vld [vmem:[%s2204_s22 + $0x31] sm:$0xff] }
  0x18   : > { %1971 = vmatprep.mubr.msk.f32.mxu1 %vm201_vm1, %v181_v13  ;;  %v2292_v23 = vld [vmem:[%s2204_s22 + $0x40] sm:$0xff]  ;;  %v2308_v25 = vld [vmem:[%s2204_s22 + $0x50] sm:$0xff] }
  0x19   : > { %v2295_v24 = vld [vmem:[%s2204_s22 + $0x41] sm:$0xff]  ;;  %v2311_v26 = vld [vmem:[%s2204_s22 + $0x51] sm:$0xff] }
  0x1a   : > { %1986 = vmatmul.mubr.msk.f32.vlgmr.msra.gmra.mxu0 %vm201_vm1, %v2261_v16  ;;  %v2314_v27 = vld [vmem:[%s2204_s22 + $0x60] sm:$0xff]  ;;  %v2328_v29 = vld [vmem:[%s2204_s22 + $0x70] sm:$0xff] }
  0x1b   : > { %1972 = vmatmul.mubr.msk.f32.vlgmr.msra.gmra.mxu1 %vm201_vm1, %v2258_v15  ;;  %2012 = vmatpush3.msk.msra.mxu0 %vm226_vm0, %v1789_v10  ;;  %v2317_v28 = vld [vmem:[%s2204_s22 + $0x61] sm:$0xff]  ;;  %v2331_v30 = vld [vmem:[%s2204_s22 + $0x71] sm:$0xff] }
  0x1c   : > { %1998 = vmatpush3.msk.msra.mxu1 %vm226_vm0, %v1771_v9  ;;  %1974 = vmatprep.mubr.msk.f32.mxu1 %vm201_vm1, %v2264_v17  ;;  %v1763_v31 = vld [vmem:[%s2204_s22 + $0x120] sm:$0xff]  ;;  %v1781_v32 = vld [vmem:[%s2204_s22 + $0x1b0] sm:$0xff] }
  0x1d   : > { %1988 = vmatprep.mubr.msk.f32.mxu0 %vm201_vm1, %v2267_v18  ;;  %2025 = vmatprep.subr.msk.mxu1 %vm226_vm0, %v1807_v19  ;;  %v1764_v33 = vld [vmem:[%s2204_s22 + $0x130] sm:$0xff]  ;;  %v1782_v34 = vld [vmem:[%s2204_s22 + $0x1c0] sm:$0xff] }
  0x1e   : > { %2039 = vmatprep.subr.msk.mxu0 %vm226_vm0, %v1825_v20  ;;  %1989 = vmatmul.mubr.msk.f32.gmra.mxu0 %vm201_vm1, %v2285_v22  ;;  %v1765_v35 = vld [vmem:[%s2204_s22 + $0x140] sm:$0xff]  ;;  %v1783_v36 = vld [vmem:[%s2204_s22 + $0x1d0] sm:$0xff] }
  0x1f   : > { %1975 = vmatmul.mubr.msk.f32.gmra.mxu1 %vm201_vm1, %v2282_v21  ;;  %1991 = vmatprep.mubr.msk.f32.mxu0 %vm201_vm1, %v2295_v24  ;;  %v1766_v39 = vld [vmem:[%s2204_s22 + $0x150] sm:$0xff]  ;;  %v1784_v40 = vld [vmem:[%s2204_s22 + $0x1e0] sm:$0xff] }
  0x20   : > { %1977 = vmatprep.mubr.msk.f32.mxu1 %vm201_vm1, %v2292_v23  ;;  %v1767_v41 = vld [vmem:[%s2204_s22 + $0x160] sm:$0xff]  ;;  %v1785_v42 = vld [vmem:[%s2204_s22 + $0x1f0] sm:$0xff] }
  0x21   : > { %v1768_v43 = vld [vmem:[%s2204_s22 + $0x170] sm:$0xff]  ;;  %v1786_v44 = vld [vmem:[%s2204_s22 + $0x200] sm:$0xff] }
  0x22   : > { %1992 = vmatmul.mubr.msk.f32.gmra.mxu0 %vm201_vm1, %v2311_v26  ;;  %v1769_v45 = vld [vmem:[%s2204_s22 + $0x180] sm:$0xff]  ;;  %v1787_v46 = vld [vmem:[%s2204_s22 + $0x210] sm:$0xff] }
  0x23   : > { %1978 = vmatmul.mubr.msk.f32.gmra.mxu1 %vm201_vm1, %v2308_v25  ;;  %1994 = vmatprep.mubr.msk.f32.mxu0 %vm201_vm1, %v2317_v28  ;;  %v1770_v47 = vld [vmem:[%s2204_s22 + $0x190] sm:$0xff]  ;;  %v1788_v48 = vld [vmem:[%s2204_s22 + $0x220] sm:$0xff] }
  0x24   : > { %1980 = vmatprep.mubr.msk.f32.mxu1 %vm201_vm1, %v2314_v27  ;;  %v1799_v49 = vld [vmem:[%s2204_s22 + $0x121] sm:$0xff]  ;;  %v1800_v50 = vld [vmem:[%s2204_s22 + $0x131] sm:$0xff] }
  0x25   : > { %v1801_v51 = vld [vmem:[%s2204_s22 + $0x141] sm:$0xff]  ;;  %v1802_v52 = vld [vmem:[%s2204_s22 + $0x151] sm:$0xff] }
  0x26   : > { %1995 = vmatmul.mubr.msk.f32.gmra.mxu0 %vm201_vm1, %v2331_v30  ;;  %v1803_v53 = vld [vmem:[%s2204_s22 + $0x161] sm:$0xff]  ;;  %v1804_v54 = vld [vmem:[%s2204_s22 + $0x171] sm:$0xff] }
  0x27   : > { %1981 = vmatmul.mubr.msk.f32.gmra.mxu1 %vm201_vm1, %v2328_v29  ;;  %2013 = vmatprep.mubr.msk.f32.mxu0 %vm201_vm1, %v1781_v32  ;;  %v1805_v55 = vld [vmem:[%s2204_s22 + $0x181] sm:$0xff]  ;;  %v1806_v56 = vld [vmem:[%s2204_s22 + $0x191] sm:$0xff] }
  0x28   : > { %1999 = vmatprep.mubr.msk.f32.mxu1 %vm201_vm1, %v1763_v31  ;;  %v1824_v57 = vld [vmem:[%s2204_s22 + $0x80] sm:$0xff]  ;;  %v1842_v58 = vld [vmem:[%s2204_s22 + $0x110] sm:$0xff] }
  0x29   : > { %v1860_v59 = vld [vmem:[%s2204_s22 + $0x81] sm:$0xff] }
  0x2a   : > { %2014 = vmatmul.mubr.msk.f32.vlgmr.msra.gmra.mxu0 %vm201_vm1, %v1782_v34 }
  0x2b   : > { %2000 = vmatmul.mubr.msk.f32.vlgmr.msra.gmra.mxu1 %vm201_vm1, %v1764_v33  ;;  %2040 = vmatpush3.msk.msra.mxu0 %vm226_vm0, %v1825_v20 }
  0x2c   : > { %2026 = vmatpush3.msk.msra.mxu1 %vm226_vm0, %v1807_v19  ;;  %2002 = vmatprep.mubr.msk.f32.mxu1 %vm201_vm1, %v1765_v35 }
  0x2d   : > { %2016 = vmatprep.mubr.msk.f32.mxu0 %vm201_vm1, %v1783_v36  ;;  %2053 = vmatprep.subr.msk.mxu1 %vm226_vm0, %v1843_v37 }
  0x2e   : > { %2067 = vmatprep.subr.msk.mxu0 %vm226_vm0, %v1861_v38  ;;  %2017 = vmatmul.mubr.msk.f32.gmra.mxu0 %vm201_vm1, %v1784_v40 }
  0x2f   : > { %2003 = vmatmul.mubr.msk.f32.gmra.mxu1 %vm201_vm1, %v1766_v39  ;;  %2019 = vmatprep.mubr.msk.f32.mxu0 %vm201_vm1, %v1785_v42 }
  0x30   : > { %2005 = vmatprep.mubr.msk.f32.mxu1 %vm201_vm1, %v1767_v41 }
  0x32   : > { %2020 = vmatmul.mubr.msk.f32.gmra.mxu0 %vm201_vm1, %v1786_v44 }
  0x33   : > { %2006 = vmatmul.mubr.msk.f32.gmra.mxu1 %vm201_vm1, %v1768_v43  ;;  %2022 = vmatprep.mubr.msk.f32.mxu0 %vm201_vm1, %v1787_v46 }
  0x34   : > { %2008 = vmatprep.mubr.msk.f32.mxu1 %vm201_vm1, %v1769_v45 }
  0x36   : > { %2023 = vmatmul.mubr.msk.f32.gmra.mxu0 %vm201_vm1, %v1788_v48 }
  0x37   : > { %2009 = vmatmul.mubr.msk.f32.gmra.mxu1 %vm201_vm1, %v1770_v47  ;;  %2041 = vmatprep.mubr.msk.f32.mxu0 %vm201_vm1, %v2258_v15 }
  0x38   : > { %2027 = vmatprep.mubr.msk.f32.mxu1 %vm201_vm1, %v1799_v49 }
  0x3a   : > { %2042 = vmatmul.mubr.msk.f32.vlgmr.msra.gmra.mxu0 %vm201_vm1, %v2264_v17 }
  0x3b   : > { %2028 = vmatmul.mubr.msk.f32.vlgmr.msra.gmra.mxu1 %vm201_vm1, %v1800_v50  ;;  %2068 = vmatpush3.msk.msra.mxu0 %vm226_vm0, %v1861_v38 }
  0x3c   : > { %2054 = vmatpush3.msk.msra.mxu1 %vm226_vm0, %v1843_v37  ;;  %2030 = vmatprep.mubr.msk.f32.mxu1 %vm201_vm1, %v1801_v51 }
  0x3d   : > { %2044 = vmatprep.mubr.msk.f32.mxu0 %vm201_vm1, %v2282_v21 }
  0x3e   : > { %2045 = vmatmul.mubr.msk.f32.gmra.mxu0 %vm201_vm1, %v2292_v23 }
  0x3f   : > { %2031 = vmatmul.mubr.msk.f32.gmra.mxu1 %vm201_vm1, %v1802_v52  ;;  %2047 = vmatprep.mubr.msk.f32.mxu0 %vm201_vm1, %v2308_v25 }
  0x40   : > { %2033 = vmatprep.mubr.msk.f32.mxu1 %vm201_vm1, %v1803_v53 }
  0x42   : > { %2048 = vmatmul.mubr.msk.f32.gmra.mxu0 %vm201_vm1, %v2314_v27 }
  0x43   : > { %2034 = vmatmul.mubr.msk.f32.gmra.mxu1 %vm201_vm1, %v1804_v54  ;;  %2050 = vmatprep.mubr.msk.f32.mxu0 %vm201_vm1, %v2328_v29 }
  0x44   : > { %2036 = vmatprep.mubr.msk.f32.mxu1 %vm201_vm1, %v1805_v55 }
  0x46   : > { %2051 = vmatmul.mubr.msk.f32.gmra.mxu0 %vm201_vm1, %v1824_v57 }
  0x47   : > { %2037 = vmatmul.mubr.msk.f32.gmra.mxu1 %vm201_vm1, %v1806_v56  ;;  %2069 = vmatprep.mubr.msk.f32.mxu0 %vm201_vm1, %v2261_v16 }
  0x48   : > { %2055 = vmatprep.mubr.msk.f32.mxu1 %vm201_vm1, %v2211_v5 }
  0x4a   : > { %2070 = vmatmul.mubr.msk.f32.vlgmr.msra.gmra.mxu0 %vm201_vm1, %v2267_v18 }
  0x4b   : > { %2056 = vmatmul.mubr.msk.f32.vlgmr.msra.gmra.mxu1 %vm201_vm1, %v2220_v7  ;;  %2072 = vmatprep.mubr.msk.f32.mxu0 %vm201_vm1, %v2285_v22 }
  0x4c   : > { %2058 = vmatprep.mubr.msk.f32.mxu1 %vm201_vm1, %v2238_v11 }
  0x4e   : > { %2073 = vmatmul.mubr.msk.f32.gmra.mxu0 %vm201_vm1, %v2295_v24 }
  0x4f   : > { %2059 = vmatmul.mubr.msk.f32.gmra.mxu1 %vm201_vm1, %v2208_v4  ;;  %2075 = vmatprep.mubr.msk.f32.mxu0 %vm201_vm1, %v2311_v26 }
  0x50   : > { %2061 = vmatprep.mubr.msk.f32.mxu1 %vm201_vm1, %v2217_v6 }
  0x52   : > { %2076 = vmatmul.mubr.msk.f32.gmra.mxu0 %vm201_vm1, %v2317_v28 }
  0x53   : > { %2062 = vmatmul.mubr.msk.f32.gmra.mxu1 %vm201_vm1, %v2223_v8  ;;  %2078 = vmatprep.mubr.msk.f32.mxu0 %vm201_vm1, %v2331_v30 }
  0x54   : > { %2064 = vmatprep.mubr.msk.f32.mxu1 %vm201_vm1, %v2241_v12 }
  0x56   : > { %2079 = vmatmul.mubr.msk.f32.gmra.mxu0 %vm201_vm1, %v1860_v59 }
  0x57   : > { %2065 = vmatmul.mubr.msk.f32.gmra.mxu1 %vm201_vm1, %v1842_v58 }
  0xd2   : > { %v1959_v60 = vpop.f32.mrf.mxu0 }
  0xd3   : > { %v1965_v61 = vpop.f32.mrf.mxu1 }
  0xd4   : > { %v296_v62 = vpop.f32.mrf.mxu0 }
  0xd5   : > { %v316_v63 = vpop.f32.mrf.mxu1 }
  0xd6   : > { %v1962_v0 = vpop.f32.mrf.mxu0 }
  0xd7   : > { %v2445_v1 = vpop.f32.mrf.mxu1 }
  0xd8   : > { %v306_v2 = vpop.f32.mrf.mxu0 }
  0xd9   : > { %v2447_v3 = vpop.f32.mrf.mxu1 }
  0xda   : > { %v1987_v5 = vpop.f32.mrf.mxu0 }
  0xdb   : > { %v1973_v4 = vpop.f32.mrf.mxu1 }
  0xdc   : > { %v570_v7 = vpop.f32.mrf.mxu0  ;;  %v434_v38 = vadd.f32 %v1973_v4, %v1959_v60 }
  0xdd   : > { %v428_v6 = vpop.f32.mrf.mxu1 }
  0xde   : > { %v1990_v9 = vpop.f32.mrf.mxu0  ;;  %v429_v39 = vadd.f32 %v428_v6, %v296_v62  ;;  %v610_v44 = vadd.f32 %v1987_v5, %v434_v38 }
  0xdf   : > { %v1976_v8 = vpop.f32.mrf.mxu1 }
  0xe0   : > { %v580_v11 = vpop.f32.mrf.mxu0  ;;  %v609_v45 = vadd.f32 %v570_v7, %v429_v39  ;;  %v444_v46 = vadd.f32 %v1976_v8, %v1962_v0 }
  0xe1   : > { %v438_v10 = vpop.f32.mrf.mxu1 }
  0xe2   : > { %v1993_v13 = vpop.f32.mrf.mxu0  ;;  %v439_v47 = vadd.f32 %v438_v10, %v306_v2  ;;  %v612_v56 = vadd.f32 %v1990_v9, %v444_v46 }
  0xe3   : > { %v1979_v12 = vpop.f32.mrf.mxu1 }
  0xe4   : > { %v590_v15 = vpop.f32.mrf.mxu0  ;;  %v454_v52 = vadd.f32 %v1979_v12, %v1965_v61  ;;  %v611_v57 = vadd.f32 %v580_v11, %v439_v47 }
  0xe5   : > { %v448_v14 = vpop.f32.mrf.mxu1 }
  0xe6   : > { %v1996_v17 = vpop.f32.mrf.mxu0  ;;  %v449_v53 = vadd.f32 %v448_v14, %v316_v63  ;;  %v614_v5 = vadd.f32 %v1993_v13, %v454_v52 }
  0xe7   : > { %v1982_v16 = vpop.f32.mrf.mxu1 }
  0xe8   : > { %v600_v19 = vpop.f32.mrf.mxu0  ;;  %v613_v7 = vadd.f32 %v590_v15, %v449_v53  ;;  %v464_v0 = vadd.f32 %v1982_v16, %v2445_v1 }
  0xe9   : > { %v458_v18 = vpop.f32.mrf.mxu1 }
  0xea   : > { %v2015_v21 = vpop.f32.mrf.mxu0  ;;  %v459_v2 = vadd.f32 %v458_v18, %v2447_v3 }
  0xeb   : > { %v2001_v20 = vpop.f32.mrf.mxu1 }
  0xec   : > { %v872_v23 = vpop.f32.mrf.mxu0  ;;  %v761_v50 = vadd.f32 %v2001_v20, %v610_v44 }
  0xed   : > { %v721_v22 = vpop.f32.mrf.mxu1 }
  0xee   : > { %v2018_v25 = vpop.f32.mrf.mxu0  ;;  %v760_v51 = vadd.f32 %v721_v22, %v609_v45  ;;  %v912_v60 = vadd.f32 %v2015_v21, %v761_v50  ;;  %v616_v21 = vadd.f32 %v1996_v17, %v464_v0 }
  0xef   : > { %v2004_v24 = vpop.f32.mrf.mxu1 }
  0xf0   : > { %v882_v27 = vpop.f32.mrf.mxu0  ;;  %v911_v62 = vadd.f32 %v872_v23, %v760_v51  ;;  %v763_v4 = vadd.f32 %v2004_v24, %v612_v56  ;;  %v615_v23 = vadd.f32 %v600_v19, %v459_v2 }
  0xf1   : > { %v731_v26 = vpop.f32.mrf.mxu1 }
  0xf2   : > { %v2021_v29 = vpop.f32.mrf.mxu0  ;;  %v762_v6 = vadd.f32 %v731_v26, %v611_v57  ;;  %v914_v20 = vadd.f32 %v2018_v25, %v763_v4 }
  0xf3   : > { %v2007_v28 = vpop.f32.mrf.mxu1 }
  0xf4   : > { %v892_v31 = vpop.f32.mrf.mxu0  ;;  %v765_v12 = vadd.f32 %v2007_v28, %v614_v5  ;;  %v913_v22 = vadd.f32 %v882_v27, %v762_v6 }
  0xf5   : > { %v741_v30 = vpop.f32.mrf.mxu1 }
  0xf6   : > { %v2449_v33 = vpop.f32.mrf.mxu0  ;;  %v764_v14 = vadd.f32 %v741_v30, %v613_v7  ;;  %v916_v16 = vadd.f32 %v2021_v29, %v765_v12 }
  0xf7   : > { %v2010_v32 = vpop.f32.mrf.mxu1 }
  0xf8   : > { %v2451_v35 = vpop.f32.mrf.mxu0  ;;  %v915_v3 = vadd.f32 %v892_v31, %v764_v14  ;;  %v767_v18 = vadd.f32 %v2010_v32, %v616_v21 }
  0xf9   : > { %v751_v34 = vpop.f32.mrf.mxu1 }
  0xfa   : > { %v2043_v37 = vpop.f32.mrf.mxu0 }
  0xfb   : > { %v2029_v36 = vpop.f32.mrf.mxu1 }
  0xfc   : > { %v1173_v41 = vpop.f32.mrf.mxu0  ;;  %v1062_v61 = vadd.f32 %v2029_v36, %v912_v60 }
  0xfd   : > { %v1022_v40 = vpop.f32.mrf.mxu1 }
  0xfe   : > { %v2046_v43 = vpop.f32.mrf.mxu0  ;;  %v1061_v63 = vadd.f32 %v1022_v40, %v911_v62  ;;  %v1213_v13 = vadd.f32 %v2043_v37, %v1062_v61  ;;  %v766_v40 = vadd.f32 %v751_v34, %v615_v23  ;;  %v918_v37 = vadd.f32 %v2449_v33, %v767_v18 }
  0xff   : > { %v2032_v42 = vpop.f32.mrf.mxu1 }
 0x100   : > { %v1183_v49 = vpop.f32.mrf.mxu0  ;;  %v1212_v15 = vadd.f32 %v1173_v41, %v1061_v63  ;;  %v1064_v38 = vadd.f32 %v2032_v42, %v914_v20  ;;  %v917_v29 = vadd.f32 %v2451_v35, %v766_v40 }
 0x101   : > { %v1032_v48 = vpop.f32.mrf.mxu1 }
 0x102   : > { %v2049_v55 = vpop.f32.mrf.mxu0  ;;  %v1063_v1 = vadd.f32 %v1032_v48, %v913_v22  ;;  %v1215_v17 = vadd.f32 %v2046_v43, %v1064_v38 }
 0x103   : > { %v2035_v54 = vpop.f32.mrf.mxu1 }
 0x104   : > { %v1193_v59 = vpop.f32.mrf.mxu0  ;;  %v1066_v44 = vadd.f32 %v2035_v54, %v916_v16  ;;  %v1214_v19 = vadd.f32 %v1183_v49, %v1063_v1 }
 0x105   : > { %v1042_v58 = vpop.f32.mrf.mxu1 }
 0x106   : > { %v2052_v10 = vpop.f32.mrf.mxu0  ;;  %v1065_v45 = vadd.f32 %v1042_v58, %v915_v3  ;;  %v1217_v48 = vadd.f32 %v2049_v55, %v1066_v44 }
 0x107   : > { %v2038_v8 = vpop.f32.mrf.mxu1 }
 0x108   : > { %v1203_v11 = vpop.f32.mrf.mxu0  ;;  %v1216_v34 = vadd.f32 %v1193_v59, %v1065_v45  ;;  %v1068_v52 = vadd.f32 %v2038_v8, %v918_v37 }
 0x109   : > { %v1052_v9 = vpop.f32.mrf.mxu1 }
 0x10a   : > { %v2071_v26 = vpop.f32.mrf.mxu0  ;;  %v1067_v53 = vadd.f32 %v1052_v9, %v917_v29  ;;  %v1219_v35 = vadd.f32 %v2052_v10, %v1068_v52 }
 0x10b   : > { %v2057_v24 = vpop.f32.mrf.mxu1 }
 0x10c   : > { %v1474_v36 = vpop.f32.mrf.mxu0  ;;  %v1364_v28 = vadd.f32 %v2057_v24, %v1213_v13  ;;  %v1218_v6 = vadd.f32 %v1203_v11, %v1067_v53 }
 0x10d   : > { %v1324_v39 = vpop.f32.mrf.mxu1 }
 0x10e   : > { %v1363_v30 = vadd.f32 %v1324_v39, %v1212_v15  ;;  %v2074_v27 = vpop.f32.mrf.mxu0  ;;  %v1514_v31 = vadd.f32 %v2071_v26, %v1364_v28 }
 0x10f   : > { %v2060_v25 = vpop.f32.mrf.mxu1 }
 0x110   : > { %v1513_v46 = vadd.f32 %v1474_v36, %v1363_v30  ;;  %v1484_v42 = vpop.f32.mrf.mxu0  ;;  %v1366_v32 = vadd.f32 %v2060_v25, %v1215_v17 }
 0x111   : > { %v1334_v41 = vpop.f32.mrf.mxu1 }
 0x112   : > { %v1365_v47 = vadd.f32 %v1334_v41, %v1214_v19  ;;  %v2077_v51 = vpop.f32.mrf.mxu0  ;;  %v1521_v54 = vadd.f32 %v1514_v31, %v1513_v46  ;;  %v1516_v57 = vadd.f32 %v2074_v27, %v1366_v32 }
 0x113   : > { %v2063_v50 = vpop.f32.mrf.mxu1 }
 0x114   : > { %v1515_v56 = vadd.f32 %v1484_v42, %v1365_v47  ;;  %v1494_v49 = vpop.f32.mrf.mxu0  ;;  %v1368_v33 = vadd.f32 %v2063_v50, %v1217_v48 }
 0x115   : > { %v1344_v43 = vpop.f32.mrf.mxu1 }
 0x116   : > { %v1522_v58 = vadd.f32 %v1521_v54, %v1515_v56  ;;  %v1367_v60 = vadd.f32 %v1344_v43, %v1216_v34  ;;  %v2080_v4 = vpop.f32.mrf.mxu0  ;;  %v1518_v59 = vadd.f32 %v2077_v51, %v1368_v33 }
 0x117   : > { %v2066_v62 = vpop.f32.mrf.mxu1 }
 0x118   : > { %v1517_v5 = vadd.f32 %v1494_v49, %v1367_v60  ;;  %v1523_v7 = vadd.f32 %v1522_v58, %v1516_v57  ;;  %v1370_v2 = vadd.f32 %v2066_v62, %v1219_v35  ;;  %v1504_v61 = vpop.f32.mrf.mxu0 }
 0x119   : > { %v1354_v55 = vpop.f32.mrf.mxu1 }
 0x11a   : > { %v1524_v0 = vadd.f32 %v1523_v7, %v1517_v5  ;;  %v1369_v8 = vadd.f32 %v1354_v55, %v1218_v6  ;;  %v1520_v14 = vadd.f32 %v2080_v4, %v1370_v2 }
 0x11c   : > { %v1519_v63 = vadd.f32 %v1504_v61, %v1369_v8  ;;  %v1525_v12 = vadd.f32 %v1524_v0, %v1518_v59 }
 0x11e   : > { %v1526_v9 = vadd.f32 %v1525_v12, %v1519_v63 }
 0x120   : > { %v1527_v20 = vadd.f32 %v1526_v9, %v1520_v14 }
 0x122   : > { %v1528_v22 = vrot.slane %v1527_v20, 4 }
 0x124   : > { %v1529_v21 = vadd.f32 %v1528_v22, %v1527_v20 }
 0x126   : > { %v1530_v23 = vrot.slane %v1529_v21, 2 }
 0x128   : > { %v1531_v24 = vadd.f32 %v1530_v23, %v1529_v21 }
 0x12a   : > { %v1532_v26 = vrot.slane %v1531_v24, 1 }
 0x12c   : > { %v1533_v10 = vadd.f32 %v1532_v26, %v1531_v24 }
 0x12e   : > { %v1535_v11 = vmul.f32 0.015625, %v1533_v10 }
 0x130   : > { %v1536_v13 = vsub.f32 %v1513_v46, %v1535_v11  ;;  %v1537_v15 = vsub.f32 %v1514_v31, %v1535_v11  ;;  %v1538_v38 = vsub.f32 %v1515_v56, %v1535_v11  ;;  %v1539_v1 = vsub.f32 %v1516_v57, %v1535_v11 }
 0x131   : > { %v1540_v18 = vsub.f32 %v1517_v5, %v1535_v11  ;;  %v1541_v40 = vsub.f32 %v1518_v59, %v1535_v11  ;;  %v1542_v44 = vsub.f32 %v1519_v63, %v1535_v11  ;;  %v1543_v27 = vsub.f32 %v1520_v14, %v1535_v11 }
 0x132   : > { %v1544_v16 = vmul.f32 %v1536_v13, %v1536_v13  ;;  %v1545_v3 = vmul.f32 %v1537_v15, %v1537_v15  ;;  %v1546_v39 = vmul.f32 %v1538_v38, %v1538_v38  ;;  %v1547_v28 = vmul.f32 %v1539_v1, %v1539_v1 }
 0x133   : > { %v1548_v45 = vmul.f32 %v1540_v18, %v1540_v18  ;;  %v1549_v17 = vmul.f32 %v1541_v40, %v1541_v40  ;;  %v1550_v37 = vmul.f32 %v1542_v44, %v1542_v44  ;;  %v1551_v46 = vmul.f32 %v1543_v27, %v1543_v27 }
 0x134   : > { %v1552_v36 = vadd.f32 %v1545_v3, %v1544_v16 }
 0x136   : > { %v1553_v30 = vadd.f32 %v1552_v36, %v1546_v39 }
 0x138   : > { %v1554_v25 = vadd.f32 %v1553_v30, %v1547_v28 }
 0x13a   : > { %v1555_v19 = vadd.f32 %v1554_v25, %v1548_v45 }
 0x13c   : > { %v1556_v41 = vadd.f32 %v1555_v19, %v1549_v17 }
 0x13e   : > { %v1557_v42 = vadd.f32 %v1556_v41, %v1550_v37 }
 0x140   : > { %v1558_v29 = vadd.f32 %v1557_v42, %v1551_v46 }
 0x142   : > { %v1559_v31 = vrot.slane %v1558_v29, 4 }
 0x144   : > { %v1560_v32 = vadd.f32 %v1559_v31, %v1558_v29 }
 0x146   : > { %v1561_v47 = vrot.slane %v1560_v32, 2 }
 0x148   : > { %v1562_v48 = vadd.f32 %v1561_v47, %v1560_v32 }
 0x14a   : > { %v1563_v34 = vrot.slane %v1562_v48, 1 }
 0x14c   : > { %v1564_v50 = vadd.f32 %v1563_v34, %v1562_v48 }
 0x14e   : > { %v1565_v51 = vmul.f32 0.015625, %v1564_v50 }
 0x150   : > { %v1566_v52 = vadd.f32 1e-05, %v1565_v51 }
 0x152   : > { %2108 = vrsqrt.f32 %v1566_v52 }
 0x15f   : > { %v2109_v53 = vpop.eup %2108 }
 0x160   : > { %v1568_v54 = vmul.f32 %v2109_v53, %v1536_v13  ;;  %v1569_v56 = vmul.f32 %v2109_v53, %v1537_v15  ;;  %v1570_v43 = vmul.f32 %v2109_v53, %v1538_v38  ;;  %v1571_v49 = vmul.f32 %v2109_v53, %v1539_v1 }
 0x161   : > { %v1572_v57 = vmul.f32 %v2109_v53, %v1540_v18  ;;  %v1573_v58 = vmul.f32 %v2109_v53, %v1541_v40  ;;  %v1574_v33 = vmul.f32 %v2109_v53, %v1542_v44  ;;  %v1575_v35 = vmul.f32 %v2109_v53, %v1543_v27 }
 0x162   : > { %v1584_v60 = vmul.f32 0.70710677, %v1568_v54  ;;  %v1585_v62 = vmul.f32 0.70710677, %v1569_v56  ;;  %v1586_v4 = vmul.f32 0.70710677, %v1570_v43 }
 0x163   : > { %v1587_v6 = vmul.f32 0.70710677, %v1571_v49  ;;  %v1588_v5 = vmul.f32 0.70710677, %v1572_v57  ;;  %v1589_v7 = vmul.f32 0.70710677, %v1573_v58 }
 0x164   : > { %2110 = verf.f32 %v1584_v60  ;;  %v1590_v55 = vmul.f32 0.70710677, %v1574_v33  ;;  %v1591_v59 = vmul.f32 0.70710677, %v1575_v35  ;;  %v1576_v8 = vmul.f32 0.5, %v1568_v54 }
 0x165   : > { %2112 = verf.f32 %v1585_v62  ;;  %v1577_v12 = vmul.f32 0.5, %v1569_v56  ;;  %v1578_v20 = vmul.f32 0.5, %v1570_v43  ;;  %v1579_v24 = vmul.f32 0.5, %v1571_v49 }
 0x166   : > { %2114 = verf.f32 %v1586_v4  ;;  %v1580_v13 = vmul.f32 0.5, %v1572_v57  ;;  %v1581_v16 = vmul.f32 0.5, %v1573_v58  ;;  %v1582_v36 = vmul.f32 0.5, %v1574_v33 }
 0x167   : > { %2116 = verf.f32 %v1587_v6  ;;  %v1583_v30 = vmul.f32 0.5, %v1575_v35 }
 0x168   : > { %2118 = verf.f32 %v1588_v5 }
 0x169   : > { %2120 = verf.f32 %v1589_v7 }
 0x16a   : > { %2122 = verf.f32 %v1590_v55 }
 0x16b   : > { %2124 = verf.f32 %v1591_v59 }
 0x171   : > { %v2111_v0 = vpop.eup %2110 }
 0x172   : > { %v2113_v2 = vpop.eup %2112  ;;  %v1600_v61 = vadd.f32 1.0, %v2111_v0 }
 0x173   : > { %v2115_v63 = vpop.eup %2114  ;;  %v1601_v14 = vadd.f32 1.0, %v2113_v2 }
 0x174   : > { %v2117_v9 = vpop.eup %2116  ;;  %v1602_v22 = vadd.f32 1.0, %v2115_v63  ;;  %v1608_v21 = vmul.f32 %v1600_v61, %v1576_v8 }
 0x175   : > { %v2119_v23 = vpop.eup %2118  ;;  %v1603_v26 = vadd.f32 1.0, %v2117_v9  ;;  %v1609_v10 = vmul.f32 %v1601_v14, %v1577_v12 }
 0x176   : > { %v2121_v11 = vpop.eup %2120  ;;  %v1604_v15 = vadd.f32 1.0, %v2119_v23  ;;  %v1610_v38 = vmul.f32 %v1602_v22, %v1578_v20  ;;  %1616 = vst [vmem:[%s2461_s14] sm:$0xff] %v1608_v21 }
 0x177   : > { %v2123_v1 = vpop.eup %2122  ;;  %v1605_v3 = vadd.f32 1.0, %v2121_v11  ;;  %v1611_v18 = vmul.f32 %v1603_v26, %v1579_v24  ;;  %1617 = vst [vmem:[%s2461_s14 + $0x8] sm:$0xff] %v1609_v10 }
 0x178   : > { %v2125_v39 = vpop.eup %2124  ;;  %v1606_v40 = vadd.f32 1.0, %v2123_v1  ;;  %v1612_v28 = vmul.f32 %v1604_v15, %v1580_v13  ;;  %1618 = vst [vmem:[%s2461_s14 + $0x10] sm:$0xff] %v1610_v38 }
 0x179   : > { %v1607_v44 = vadd.f32 1.0, %v2125_v39  ;;  %v1613_v45 = vmul.f32 %v1605_v3, %v1581_v16  ;;  %1619 = vst [vmem:[%s2461_s14 + $0x18] sm:$0xff] %v1611_v18 }
 0x17a   : > { %v1614_v25 = vmul.f32 %v1606_v40, %v1582_v36  ;;  %1620 = vst [vmem:[%s2461_s14 + $0x20] sm:$0xff] %v1612_v28 }
 0x17b   : > { %v1615_v27 = vmul.f32 %v1607_v44, %v1583_v30  ;;  %1621 = vst [vmem:[%s2461_s14 + $0x28] sm:$0xff] %v1613_v45 }
 0x17c   : > { %1622 = vst [vmem:[%s2461_s14 + $0x30] sm:$0xff] %v1614_v25 }
 0x17d   : > { %1623 = vst [vmem:[%s2461_s14 + $0x38] sm:$0xff] %v1615_v27 }
 0x17e PF: > { %s12_s11 = sadd.s32 1, %s2148_s11   ;;  %s2483_s9 = smov %s2144_s10 }
 0x17f   : > { %p9_p5 = scmp.ge.s32.totalorder %s12_s11, 4   ;;  %s2484_s10 = smov %s2486_s12 }
 0x181   :  { %11 = sbr.rel (!%p9_p5) target bundleno = 2 (0x2), region = 74 }

</bundles_post_ra>
